<compile_context>
chip_gen: v5e
topology: v5e:2x2
jax: 0.10.0
libtpu: 0.0.40
codegen_flags: <defaults>
</compile_context>

<pallas_src>
import functools

import numpy as np
import jax
import jax.numpy as jnp
from jax.experimental import pallas as pl
from jax.experimental.pallas import tpu as pltpu

LANE = 128          # lane width (last-dim alignment)
SUBLANE_BF16 = 16   # packed bf16 sublane multiple (batch padding granularity)


def _round_up(x: int, m: int) -> int:
    return ((x + m - 1) // m) * m


def _device_kind() -> str:
    try:
        return jax.devices()[0].device_kind.lower()
    except Exception:
        return ""


def _vmem_cap_bytes() -> int:
    """Scoped-VMEM ceiling we are willing to request (chip-generation aware)."""
    kind = _device_kind()
    if "v4" in kind or "v5" in kind or "v6" in kind:
        return 96 * 1024 * 1024      # 128 MiB physical VMEM -> up to ~96 MiB
    return 48 * 1024 * 1024          # v7x-class: 64 MiB physical -> cap ~48 MiB


def _default_tm() -> int:
    """Batch tile: 128 on 128-wide-MXU v4/v5e, 256 on 256-wide-MXU v6e/v7x."""
    kind = _device_kind()
    if "v4" in kind or "v5" in kind:
        return 128
    return 256


def _pick_tm(M: int, default_tm: int) -> int:
    if M <= default_tm:
        return max(SUBLANE_BF16, _round_up(M, SUBLANE_BF16))
    return default_tm


def _resident_spec(block_shape):
    """BlockSpec for a grid-invariant block (weights/bias): single-buffered."""
    index_map = lambda i: (0, 0)
    try:
        return pl.BlockSpec(block_shape, index_map, pipeline_mode=pl.Buffered(1))
    except Exception:   # older jax without pipeline_mode / Buffered(1)
        return pl.BlockSpec(block_shape, index_map)


# -----------------------------------------------------------------------------
# Parameter preparation (runs ONCE, outside the jitted forward).
# -----------------------------------------------------------------------------
def prepare_mlp_params(params, compute_dtype=jnp.bfloat16):
    """Pad hidden/output dims to 128 lanes and cast weights to bf16 once.

    params: list of (w_t [Kin, Kout] f32, b [Kout] f32)  (weights transposed).
    The input feature dim (K0) is NOT padded; zero-padded weight rows/cols and
    zero bias keep the math exact (ReLU(0)=0 on padded hidden columns).
    """
    dims = [params[0][0].shape[0]] + [w_t.shape[1] for (w_t, _) in params]
    dims_p = [dims[0]] + [_round_up(d, LANE) for d in dims[1:]]
    padded = []
    for li, (w_t, b) in enumerate(params):
        kin, kout = w_t.shape
        kin_p, kout_p = dims_p[li], dims_p[li + 1]
        w_p = jnp.zeros((kin_p, kout_p), compute_dtype)
        w_p = w_p.at[:kin, :kout].set(w_t.astype(compute_dtype))
        b_p = jnp.zeros((1, kout_p), jnp.float32)
        b_p = b_p.at[0, :kout].set(b.astype(jnp.float32))
        padded += [w_p, b_p]
    return padded, tuple(dims), tuple(dims_p)


# -----------------------------------------------------------------------------
# Fast path: whole MLP fused into a single kernel (all weights VMEM-resident).
# -----------------------------------------------------------------------------
def _mlp_fused_kernel(*refs, n_layers: int):
    """refs = (x_ref, w0_ref, b0_ref, ..., o_ref) on one batch tile."""
    x_ref = refs[0]
    o_ref = refs[-1]
    h = x_ref[...].astype(jnp.bfloat16)          # in-kernel cast (f32 -> bf16)
    for i in range(n_layers):
        w_ref = refs[1 + 2 * i]
        b_ref = refs[2 + 2 * i]
        acc = jnp.dot(h, w_ref[...], preferred_element_type=jnp.float32)
        acc = acc + b_ref[...]                   # f32 bias broadcast over rows
        if i < n_layers - 1:
            acc = jnp.maximum(acc, 0.0)          # ReLU; Dropout(0.1) = identity (eval)
            h = acc.astype(jnp.bfloat16)
        else:
            o_ref[...] = acc.astype(o_ref.dtype)


def _fused_vmem_need(tm, dims_p, out_bytes):
    n_layers = len(dims_p) - 1
    x_b = 2 * tm * dims_p[0] * 4                       # f32 x tile, double-buffered
    o_b = 2 * tm * dims_p[-1] * out_bytes              # output tile, double-buffered
    w_b = sum(dims_p[i] * dims_p[i + 1] * 2 for i in range(n_layers))   # bf16, 1-buf
    b_b = sum(dims_p[i + 1] * 4 for i in range(n_layers))
    act_b = tm * max(dims_p[1:]) * (4 + 2)             # f32 acc + bf16 h temporaries
    return x_b + o_b + w_b + b_b + act_b


def _mlp_fused(x, padded_params, dims_p, tm, out_dtype, vmem_bytes):
    M, _ = x.shape
    M_p = _round_up(M, tm)
    if M_p != M:
        x = jnp.pad(x, ((0, M_p - M), (0, 0)))         # batch padding only
    grid_m = M_p // tm
    n_layers = len(dims_p) - 1

    in_specs = [pl.BlockSpec((tm, dims_p[0]), lambda i: (i, 0))]
    for li in range(n_layers):
        kin_p, kout_p = dims_p[li], dims_p[li + 1]
        in_specs.append(_resident_spec((kin_p, kout_p)))   # weight (single-buffered)
        in_specs.append(_resident_spec((1, kout_p)))       # bias   (single-buffered)

    return pl.pallas_call(
        functools.partial(_mlp_fused_kernel, n_layers=n_layers),
        out_shape=jax.ShapeDtypeStruct((M_p, dims_p[-1]), out_dtype),
        grid=(grid_m,),
        in_specs=in_specs,
        out_specs=pl.BlockSpec((tm, dims_p[-1]), lambda i: (i, 0)),
        compiler_params=pltpu.CompilerParams(
            dimension_semantics=("parallel",),
            vmem_limit_bytes=vmem_bytes,
        ),
    )(x, *padded_params)


# -----------------------------------------------------------------------------
# Fallback path: per-layer (M, N, K)-tiled matmul + bias (+ReLU) with f32
# VMEM accumulator.  Used when the resident weights would not fit VMEM.
# -----------------------------------------------------------------------------
def _linear_tiled_kernel(x_ref, w_ref, b_ref, o_ref, acc_ref, *, relu: bool):
    @pl.when(pl.program_id(2) == 0)
    def _():
        acc_ref[...] = jnp.zeros_like(acc_ref)

    acc_ref[...] += jnp.dot(x_ref[...].astype(jnp.bfloat16), w_ref[...],
                            preferred_element_type=jnp.float32)

    @pl.when(pl.program_id(2) == pl.num_programs(2) - 1)
    def _():
        r = acc_ref[...] + b_ref[...]
        if relu:
            r = jnp.maximum(r, 0.0)      # ReLU; Dropout(0.1) = identity (eval)
        o_ref[...] = r.astype(o_ref.dtype)


def _pick_tile(dim: int, pref: int = 512) -> int:
    if dim % LANE != 0:
        return dim                       # not lane-aligned: take the full dim
    t = max(LANE, (min(pref, dim) // LANE) * LANE)
    while dim % t != 0:
        t -= LANE
    return t


def _mlp_tiled(x, padded_params, dims_p, tm, out_dtype, vmem_cap):
    M, _ = x.shape
    M_p = _round_up(M, tm)
    if M_p != M:
        x = jnp.pad(x, ((0, M_p - M), (0, 0)))
    grid_m = M_p // tm
    n_layers = len(dims_p) - 1

    h = x
    for li in range(n_layers):
        w_p = padded_params[2 * li]
        b_p = padded_params[2 * li + 1]
        kin_p, kout_p = w_p.shape
        tk = _pick_tile(kin_p)
        tn = _pick_tile(kout_p)
        last = li == n_layers - 1
        o_dtype = out_dtype if last else jnp.bfloat16   # bf16 intermediates
        o_bytes = np.dtype(o_dtype).itemsize
        need = (2 * tm * tk * np.dtype(h.dtype).itemsize + 2 * tk * tn * 2
                + 2 * tn * 4 + 2 * tm * tn * o_bytes + tm * tn * 4) + (8 << 20)
        h = pl.pallas_call(
            functools.partial(_linear_tiled_kernel, relu=not last),
            out_shape=jax.ShapeDtypeStruct((M_p, kout_p), o_dtype),
            grid=(grid_m, kout_p // tn, kin_p // tk),
            in_specs=[
                pl.BlockSpec((tm, tk), lambda i, j, k: (i, k)),
                pl.BlockSpec((tk, tn), lambda i, j, k: (k, j)),
                pl.BlockSpec((1, tn), lambda i, j, k: (0, j)),
            ],
            out_specs=pl.BlockSpec((tm, tn), lambda i, j, k: (i, j)),
            scratch_shapes=[pltpu.VMEM((tm, tn), jnp.float32)],
            compiler_params=pltpu.CompilerParams(
                dimension_semantics=("parallel", "parallel", "arbitrary"),
                vmem_limit_bytes=min(max(need, 32 << 20), vmem_cap),
            ),
        )(h, w_p, b_p)
    return h


# -----------------------------------------------------------------------------
# Public forward.
# -----------------------------------------------------------------------------
def mlp_middle_forward(x, padded_params, *, dims, dims_p,
                       out_dtype=jnp.float32, mode="auto", tm=None):
    """Forward of MLP_middle.  `padded_params` comes from prepare_mlp_params()."""
    M, K0 = x.shape
    assert K0 == dims[0], "input feature dim mismatch"
    n_layers = len(dims) - 1
    assert len(padded_params) == 2 * n_layers

    tm_eff = _pick_tm(M, tm if tm is not None else _default_tm())
    cap = _vmem_cap_bytes()
    out_bytes = np.dtype(out_dtype).itemsize
    need = _fused_vmem_need(tm_eff, dims_p, out_bytes)

    use_fused = (mode == "fused") or (mode == "auto" and need <= int(cap * 0.75))
    if use_fused:
        vmem_bytes = min(cap, max(32 << 20, int(need * 1.5) + (8 << 20)))
        out_p = _mlp_fused(x, padded_params, dims_p, tm_eff, out_dtype, vmem_bytes)
    else:
        out_p = _mlp_tiled(x, padded_params, dims_p, tm_eff, out_dtype, cap)

    return out_p[:M, :dims[-1]]   # drop batch / lane padding


def init_mlp_params(key, sizes):
    """nn.Linear default init: U(-1/sqrt(fan_in), 1/sqrt(fan_in)); weights stored
    transposed ([in, out]) so y = x @ w_t + b matches PyTorch y = x @ W.T + b."""
    params = []
    for i in range(len(sizes) - 1):
        fan_in, fan_out = sizes[i], sizes[i + 1]
        key, kw, kb = jax.random.split(key, 3)
        bound = 1.0 / jnp.sqrt(jnp.float32(fan_in))
        w_t = jax.random.uniform(kw, (fan_in, fan_out), jnp.float32, -bound, bound)
        b = jax.random.uniform(kb, (fan_out,), jnp.float32, -bound, bound)
        params.append((w_t, b))
    return params


def _reference_bf16(x, params):
    """Reference with matching precision (bf16 MXU operands, f32 accumulate)."""
    ref = x
    n = len(params)
    for i, (w_t, b) in enumerate(params):
        acc = jnp.dot(ref.astype(jnp.bfloat16), w_t.astype(jnp.bfloat16),
                      preferred_element_type=jnp.float32) + b
        ref = jnp.maximum(acc, 0.0) if i < n - 1 else acc
    return ref


if __name__ == "__main__":
    # MLP_middle(sizes=(32, 64, 32)): Linear(32,64) -> ReLU -> Dropout -> Linear(64,32)
    sizes = (32, 64, 32)
    batch = 8

    key = jax.random.PRNGKey(0)
    key, kx, kx2 = jax.random.split(key, 3)
    x = jax.random.normal(kx, (batch, sizes[0]), jnp.float32)
    params = init_mlp_params(key, sizes)

    # One-time padding / bf16 cast of the parameters (hoisted out of the forward).
    padded, dims, dims_p = prepare_mlp_params(params)

    # --- Fused single-kernel path (small batch) ---
    fwd = jax.jit(functools.partial(mlp_middle_forward,
                                    dims=dims, dims_p=dims_p, mode="fused"))
    out = jax.block_until_ready(fwd(x, padded))
    assert out.shape == (batch, sizes[-1])
    ref = _reference_bf16(x, params)
    assert jnp.allclose(out, ref, atol=1e-2, rtol=1e-2), (
        f"fused max abs err {jnp.max(jnp.abs(out - ref))}")

    # Loose sanity check against full-f32 math.
    ref32 = x
    for i, (w_t, b) in enumerate(params):
        ref32 = ref32 @ w_t + b
        if i < len(params) - 1:
            ref32 = jnp.maximum(ref32, 0.0)
    assert jnp.allclose(out, ref32, atol=5e-2, rtol=5e-2)

    # --- Fused path with multiple grid steps (exercises batch tiling/padding) ---
    x_big = jax.random.normal(kx2, (300, sizes[0]), jnp.float32)
    out_big = jax.block_until_ready(fwd(x_big, padded))
    ref_big = _reference_bf16(x_big, params)
    assert out_big.shape == (300, sizes[-1])
    assert jnp.allclose(out_big, ref_big, atol=1e-2, rtol=1e-2), (
        f"fused(big) max abs err {jnp.max(jnp.abs(out_big - ref_big))}")

    # --- Tiled fallback path (used automatically when weights don't fit VMEM) ---
    fwd_tiled = jax.jit(functools.partial(mlp_middle_forward,
                                          dims=dims, dims_p=dims_p, mode="tiled"))
    out_t = jax.block_until_ready(fwd_tiled(x, padded))
    assert jnp.allclose(out_t, ref, atol=1e-2, rtol=1e-2), (
        f"tiled max abs err {jnp.max(jnp.abs(out_t - ref))}")

    print("KERNEL_OK")
</pallas_src>

<mosaic_0001>
module attributes {stable_mosaic.version = 11 : i64} {
  func.func @_mlp_fused_kernel(%arg0: i32, %arg1: memref<16x32xf32, #tpu.memory_space<vmem>>, %arg2: memref<32x128xbf16, #tpu.memory_space<vmem>>, %arg3: memref<1x128xf32, #tpu.memory_space<vmem>>, %arg4: memref<128x128xbf16, #tpu.memory_space<vmem>>, %arg5: memref<1x128xf32, #tpu.memory_space<vmem>>, %arg6: memref<16x128xf32, #tpu.memory_space<vmem>>) attributes {dimension_semantics = [#tpu.dimension_semantics<parallel>], iteration_bounds = array<i64: 1>, scalar_prefetch = 0 : i64, scratch_operands = 0 : i64, tpu.core_type = #tpu.core_type<tc>, window_params = [{transform_indices = @transform_0, window_bounds = array<i64: 16, 32>}, {pipeline_mode = #tpu.pipeline_mode<synchronous>, transform_indices = @transform_1, window_bounds = array<i64: 32, 128>}, {pipeline_mode = #tpu.pipeline_mode<synchronous>, transform_indices = @transform_2, window_bounds = array<i64: 1, 128>}, {pipeline_mode = #tpu.pipeline_mode<synchronous>, transform_indices = @transform_3, window_bounds = array<i64: 128, 128>}, {pipeline_mode = #tpu.pipeline_mode<synchronous>, transform_indices = @transform_4, window_bounds = array<i64: 1, 128>}, {transform_indices = @transform_5, window_bounds = array<i64: 16, 128>}]} {
    %c0 = arith.constant 0 : index
    %c0_0 = arith.constant 0 : index
    %0 = vector.load %arg1[%c0, %c0_0] : memref<16x32xf32, #tpu.memory_space<vmem>>, vector<16x32xf32>
    %1 = arith.truncf %0 : vector<16x32xf32> to vector<16x32xbf16>
    %c0_1 = arith.constant 0 : index
    %c0_2 = arith.constant 0 : index
    %2 = vector.load %arg2[%c0_1, %c0_2] : memref<32x128xbf16, #tpu.memory_space<vmem>>, vector<32x128xbf16>
    %cst = arith.constant dense<0.000000e+00> : vector<16x128xf32>
    %3 = tpu.matmul %1, %2, %cst {dimension_numbers = #tpu.dot_dimension_numbers<[1], [0], [0], [1], [0, 0, 1, 1], [], []>} : vector<16x32xbf16>, vector<32x128xbf16>, vector<16x128xf32> -> vector<16x128xf32>
    %c0_3 = arith.constant 0 : index
    %c0_4 = arith.constant 0 : index
    %4 = vector.load %arg3[%c0_3, %c0_4] : memref<1x128xf32, #tpu.memory_space<vmem>>, vector<1x128xf32>
    %5 = vector.broadcast %4 : vector<1x128xf32> to vector<16x128xf32>
    %6 = arith.addf %3, %5 : vector<16x128xf32>
    %cst_5 = arith.constant 0.000000e+00 : f32
    %7 = vector.broadcast %cst_5 : f32 to vector<16x128xf32>
    %8 = arith.maximumf %6, %7 : vector<16x128xf32>
    %9 = arith.truncf %8 : vector<16x128xf32> to vector<16x128xbf16>
    %c0_6 = arith.constant 0 : index
    %c0_7 = arith.constant 0 : index
    %10 = vector.load %arg4[%c0_6, %c0_7] : memref<128x128xbf16, #tpu.memory_space<vmem>>, vector<128x128xbf16>
    %cst_8 = arith.constant dense<0.000000e+00> : vector<16x128xf32>
    %11 = tpu.matmul %9, %10, %cst_8 {dimension_numbers = #tpu.dot_dimension_numbers<[1], [0], [0], [1], [0, 0, 1, 1], [], []>} : vector<16x128xbf16>, vector<128x128xbf16>, vector<16x128xf32> -> vector<16x128xf32>
    %c0_9 = arith.constant 0 : index
    %c0_10 = arith.constant 0 : index
    %12 = vector.load %arg5[%c0_9, %c0_10] : memref<1x128xf32, #tpu.memory_space<vmem>>, vector<1x128xf32>
    %13 = vector.broadcast %12 : vector<1x128xf32> to vector<16x128xf32>
    %14 = arith.addf %11, %13 : vector<16x128xf32>
    %c0_11 = arith.constant 0 : index
    %c0_12 = arith.constant 0 : index
    %15 = vector.load %arg6[%c0_11, %c0_12] : memref<16x128xf32, #tpu.memory_space<vmem>>, vector<16x128xf32>
    tpu.vector_store %arg6[%c0_11, %c0_12], %14 {strides = array<i32>} : memref<16x128xf32, #tpu.memory_space<vmem>>, vector<16x128xf32>,
    return
  }
  func.func @transform_0(%arg0: i32) -> (i32, i32) {
    %c0_i32 = arith.constant 0 : i32
    %c0_i32_0 = arith.constant 0 : i32
    return %arg0, %c0_i32 : i32, i32
  }
  func.func @transform_1(%arg0: i32) -> (i32, i32) {
    %c0_i32 = arith.constant 0 : i32
    %c0_i32_0 = arith.constant 0 : i32
    %c0_i32_1 = arith.constant 0 : i32
    return %c0_i32, %c0_i32_0 : i32, i32
  }
  func.func @transform_2(%arg0: i32) -> (i32, i32) {
    %c0_i32 = arith.constant 0 : i32
    %c0_i32_0 = arith.constant 0 : i32
    %c0_i32_1 = arith.constant 0 : i32
    return %c0_i32, %c0_i32_0 : i32, i32
  }
  func.func @transform_3(%arg0: i32) -> (i32, i32) {
    %c0_i32 = arith.constant 0 : i32
    %c0_i32_0 = arith.constant 0 : i32
    %c0_i32_1 = arith.constant 0 : i32
    return %c0_i32, %c0_i32_0 : i32, i32
  }
  func.func @transform_4(%arg0: i32) -> (i32, i32) {
    %c0_i32 = arith.constant 0 : i32
    %c0_i32_0 = arith.constant 0 : i32
    %c0_i32_1 = arith.constant 0 : i32
    return %c0_i32, %c0_i32_0 : i32, i32
  }
  func.func @transform_5(%arg0: i32) -> (i32, i32) {
    %c0_i32 = arith.constant 0 : i32
    %c0_i32_0 = arith.constant 0 : i32
    return %arg0, %c0_i32 : i32, i32
  }
}

</mosaic_0001>

<bundles_post_ra>
// kernel: mlp_middle_forward.1
= control target key start
LH: loop header
LB: loop body
LE: loop exit
PB: predicated region body
PF: predicated region fallthrough
CT: control target
= control target key end

     0   :  { %10 = vsyncpa [#allocation3], 0  ;;  %s252_s21 = smov [#allocation2]   ;;  %s253_s23 = smov 64   ;;  %s312_s0 = inlined_call_operand.vmem [shape: f32[16,32], index: 0, kind: input, shape index: {}]   ;;  %s313_s1 = inlined_call_operand.vmem [shape: bf16[32,128], index: 1, kind: input, shape index: {}]   ;;  %s314_s2 = inlined_call_operand.vmem [shape: f32[1,128], index: 2, kind: input, shape index: {}]   ;;  %s315_s3 = inlined_call_operand.hbm [shape: bf16[128,128], index: 3, kind: input, shape index: {}]   ;;  %s316_s4 = inlined_call_operand.vmem [shape: f32[1,128], index: 4, kind: input, shape index: {}]   ;;  %s317_s5 = inlined_call_operand.vmem [shape: f32[16,128], index: 5, kind: output, shape index: {}]  }
   0x1   :  { %s21_s20 = sshll.u32 %s315_s3, 4  ;;  %s23_s22 = sshll.u32 %s252_s21, 4  ;;  %s22_s20 = int_to_ptr.hbm [resolvable:$true] %s21_s20  ;;  %s24_s22 = int_to_ptr.vmem [resolvable:$true] %s23_s22 }
   0x2   :  { %s254_s24 = smov 4  }
   0x3   :  { %29 = dma.hbm_to_vmem [thread:$0]  %s22_s20, 1024, %s24_s22, [#allocation3], %s253_s23, %s253_s23, %s254_s24  }
   0x4   :  { %250 = dma.done.wait [#allocation3], 1024  }
   0x5   :  { %251 = vsyncadd [#allocation3], 4294966272  ;;  %v212_v0 = vld [vmem:[%s313_s1 + $0x8] sm:$0xff]  ;;  %v211_v1 = vld [vmem:[%s313_s1] sm:$0xff]  ;;  %vm60_vm0 = vcmask 261120  }
   0x6   :  { %v220_v2 = vld [vmem:[#allocation2 + $0x38] sm:$0xff]  ;;  %70 = vmatpush.bf16.msra.mxu0 %v212_v0  ;;  %v37_v3 = vld [vmem:[%s312_s0] sm:$0xff]  ;;  %v38_v4 = vld [vmem:[%s312_s0 + $0x8] sm:$0xff] }
   0x7   :  { %149 = vmatpush.bf16.msra.mxu1 %v220_v2  ;;  %v219_v5 = vld [vmem:[#allocation2 + $0x30] sm:$0xff]  ;;  %v39_v6 = vpack.c.bf16 %v38_v4, %v37_v3  ;;  %v218_v7 = vld [vmem:[#allocation2 + $0x28] sm:$0xff]  ;;  %v217_v8 = vld [vmem:[#allocation2 + $0x20] sm:$0xff] }
   0x8   :  { %v216_v9 = vld [vmem:[#allocation2 + $0x18] sm:$0xff]  ;;  %v215_v10 = vld [vmem:[#allocation2 + $0x10] sm:$0xff]  ;;  %v214_v11 = vld [vmem:[#allocation2 + $0x8] sm:$0xff] }
   0x9   :  { %v213_v12 = vld [vmem:[#allocation2] sm:$0xff] }
   0xa   :  { %71 = vmatpush.bf16.msra.mxu0 %v211_v1  ;;  %v224_v14 = vld [vmem:[%s314_s2] ss:$0 sm:$0xff] }
   0xb   :  { %150 = vmatpush.bf16.msra.mxu1 %v219_v5  ;;  %v225_v21 = vld [vmem:[%s316_s4] ss:$0 sm:$0xff] }
   0xd   :  { %178 = vmatmul.msk.bf16.vlgmr.msra.gmra.mxu0 %vm60_vm0, %v39_v6 }
   0xf   :  { %151 = vmatpush.bf16.msra.mxu1 %v218_v7 }
  0x13   :  { %152 = vmatpush.bf16.msra.mxu1 %v217_v8 }
  0x17   :  { %153 = vmatpush.bf16.msra.mxu1 %v216_v9 }
  0x1b   :  { %154 = vmatpush.bf16.msra.mxu1 %v215_v10 }
  0x1f   :  { %155 = vmatpush.bf16.msra.mxu1 %v214_v11 }
  0x23   :  { %156 = vmatpush.bf16.msra.mxu1 %v213_v12 }
  0x8a   :  { %v73_v13 = vpop.f32.mrf.mxu0 }
  0x8b   :  { %v74_v15 = vadd.f32 %v224_v14, %v73_v13 }
  0x8d   :  { %v78_v18 = vmax.f32 %v74_v15, 0.0 }
  0x92   :  { %v75_v16 = vpop.f32.mrf.mxu0 }
  0x93   :  { %v76_v17 = vadd.f32 %v224_v14, %v75_v16 }
  0x95   :  { %v79_v19 = vmax.f32 %v76_v17, 0.0 }
  0x97   :  { %v80_v20 = vpack.c.bf16 %v79_v19, %v78_v18 }
  0x99   :  { %157 = vmatmul.bf16.vlgmr.msra.gmra.mxu1 %v80_v20 }
 0x116   :  { %v158_v22 = vpop.f32.mrf.mxu1 }
 0x117   :  { %v159_v23 = vadd.f32 %v225_v21, %v158_v22 }
 0x119   :  { %163 = vst [vmem:[%s317_s5] sm:$0xff] %v159_v23 }
 0x11e   :  { %v160_v24 = vpop.f32.mrf.mxu1 }
 0x11f   :  { %v161_v25 = vadd.f32 %v225_v21, %v160_v24 }
 0x121   :  { %164 = vst [vmem:[%s317_s5 + $0x8] sm:$0xff] %v161_v25 }
 0x122   :  { %169 = vsyncpa [#allocation3], 1 }

</bundles_post_ra>
